<compile_context>
chip_gen: v7x
topology: tpu7x:2x2x1
jax: 0.10.0
libtpu: 0.0.40
codegen_flags: <defaults>
</compile_context>

<pallas_src>
import jax
import jax.numpy as jnp
from jax.experimental import pallas as pl
from jax.experimental.pallas import tpu as pltpu


def _round_up(x: int, m: int) -> int:
    return (x + m - 1) // m * m


def _device_kind() -> str:
    try:
        return jax.devices()[0].device_kind.lower()
    except Exception:
        return ""


def _vmem_capacity_bytes() -> int:
    try:
        cap = int(pltpu.get_tpu_info().vmem_capacity_bytes)
        if cap > 0:
            return cap
    except Exception:
        pass
    # Fallback heuristic: v7x has 64 MiB per TensorCore, v5e/v6e have 128 MiB.
    return (64 if "v7" in _device_kind() else 128) * 1024 * 1024


def _has_two_tensorcores() -> bool:
    kind = _device_kind()
    return ("v7" in kind) or ("v4" in kind)


def _prefers_256_alignment() -> bool:
    kind = _device_kind()
    return ("v6" in kind) or ("v7" in kind)


def mlp_decoder_kernel(x_ref, w1_ref, b1_ref, w2_ref, b2_ref, o_ref):
    # x: (TM, D_in)  w1: (D_in, H_p)  b1: (1, H_p)  w2: (H_p, D_out_p)  b2: (1, D_out_p)
    # Matmul operands follow the weight dtype (bf16 fast path); f32 accumulation on the MXU,
    # bias add + ReLU in f32 on the VPU.  Casting x here avoids an extra HBM cast pass.
    x = x_ref[...].astype(w1_ref.dtype)
    h = jnp.dot(x, w1_ref[...], preferred_element_type=jnp.float32)
    h = jnp.maximum(h + b1_ref[...], 0.0)
    out = jnp.dot(h.astype(w2_ref.dtype), w2_ref[...],
                  preferred_element_type=jnp.float32)
    o_ref[...] = (out + b2_ref[...]).astype(o_ref.dtype)


def intent_slot_forward(x_bsd, w1, b1, w2, b2, *, row_tile=1024,
                        compute_dtype=None, out_dtype=None,
                        min_rows_for_kernel=512):
    """Forward pass of IntentSlotLabellingModel: logits = MLPDecoder(inputs).

    compute_dtype: dtype of the matmul operands (default bfloat16 -> native MXU rate on
                   v5e/v6e/v7x).  Accumulation, biases and ReLU stay float32 either way.
    out_dtype:     logits dtype (default: same as x; pass jnp.bfloat16 to halve writeback).
    min_rows_for_kernel: below this many tokens, run plain XLA (kernel overhead dominates).
    """
    B, S, D_in = x_bsd.shape
    H = w1.shape[1]
    D_out = w2.shape[1]
    rows = B * S

    out_dt = out_dtype if out_dtype is not None else x_bsd.dtype
    cdt = compute_dtype if compute_dtype is not None else jnp.bfloat16

    # ---- small-problem fallback: a handful of tokens is cheaper in plain XLA ----------
    if rows < min_rows_for_kernel:
        x2d = x_bsd.reshape(rows, D_in)
        h = jnp.maximum(x2d @ w1 + b1.reshape(1, -1), 0.0)
        out = h @ w2 + b2.reshape(1, -1)
        return out.astype(out_dt).reshape(B, S, D_out)

    # ---- feature padding ---------------------------------------------------------------
    # D_in: never padded (x block minor dim == full array dim -> no extra pass over x).
    # H:    padded to 128 (256 on v6e/v7x when encoder-sized) -> lane-dense hidden tile.
    # D_out: tiny outputs stay unpadded (full-extent minor dim, 8x less HBM writeback);
    #        >= 64 padded to 128 for unmasked lane-dense stores, sliced afterwards.
    align_h = 256 if (H >= 512 and _prefers_256_alignment()) else 128
    H_p = _round_up(H, align_h)
    if D_out % 128 == 0 or D_out < 64:
        D_out_p = D_out
    else:
        D_out_p = _round_up(D_out, 128)

    # ---- row tile selection ------------------------------------------------------------
    tm = max(8, min(_round_up(row_tile, 8), _round_up(rows, 8)))
    if _has_two_tensorcores() and rows > 8:
        # Guarantee >= 2 grid blocks so the "parallel" axis shards across both TensorCores.
        tm = min(tm, max(8, _round_up((rows + 1) // 2, 8)))

    x_bytes = jnp.dtype(x_bsd.dtype).itemsize
    c_bytes = jnp.dtype(cdt).itemsize
    o_bytes = jnp.dtype(out_dt).itemsize

    # Resident weights/biases: budget conservatively for 2 buffers (works whether or not
    # the Buffered(1) request below is honored).
    weight_vmem = 2 * ((D_in * H_p + H_p * D_out_p) * c_bytes + (H_p + D_out_p) * 4)

    def _vmem_est(tm_):
        stream = 2 * tm_ * D_in * x_bytes + 2 * tm_ * D_out_p * o_bytes  # dbl-buffered x/out
        interm = tm_ * D_in * c_bytes                 # in-kernel bf16 copy of the x tile
        interm += tm_ * H_p * 4 + tm_ * H_p * c_bytes  # f32 hidden tile + its cast copy
        interm += tm_ * D_out_p * 4                   # f32 out tile before final cast
        return weight_vmem + stream + interm + (2 << 20)

    # Per-generation cap: ~75% of physical VMEM (48 MiB on v7x, 96 MiB on v5e/v6e) keeps
    # headroom for Mosaic internal scratch; shrink tm until the estimate fits.
    vmem_cap = (_vmem_capacity_bytes() * 3) // 4
    while _vmem_est(tm) > vmem_cap and tm > 8:
        tm = max(8, _round_up(tm // 2, 8))
    vmem_limit = int(min(vmem_cap, max(32 * 1024 * 1024, _vmem_est(tm))))

    grid = (pl.cdiv(rows, tm),)  # ragged last tile handled by Pallas masking

    # ---- operand prep (weights are tiny and resident; one-time cast/pad is cheap) -------
    x2d = x_bsd.reshape(rows, D_in)  # no pad, no cast: cast happens in-kernel
    w1p = jnp.pad(w1.astype(cdt), ((0, 0), (0, H_p - H)))
    w2p = jnp.pad(w2.astype(cdt), ((0, H_p - H), (0, D_out_p - D_out)))
    b1p = jnp.pad(b1.reshape(-1).astype(jnp.float32), (0, H_p - H)).reshape(1, H_p)
    b2p = jnp.pad(b2.reshape(-1).astype(jnp.float32),
                  (0, D_out_p - D_out)).reshape(1, D_out_p)

    cost = pl.CostEstimate(
        flops=2 * rows * (D_in * H_p + H_p * D_out_p),
        transcendentals=0,
        bytes_accessed=int(rows * D_in * x_bytes
                           + (D_in * H_p + H_p * D_out_p) * c_bytes
                           + (H_p + D_out_p) * 4
                           + rows * D_out_p * o_bytes),
    )

    def _run(single_buffer_weights):
        # Constant-index (resident) operands: request a single VMEM buffer to halve
        # resident weight VMEM; streamed x/out keep default double-buffering.
        res_kw = {"pipeline_mode": pl.Buffered(1)} if single_buffer_weights else {}
        grid_spec = pltpu.PrefetchScalarGridSpec(
            num_scalar_prefetch=0,
            grid=grid,
            in_specs=[
                pl.BlockSpec((tm, D_in), lambda i: (i, 0)),              # x row tile
                pl.BlockSpec((D_in, H_p), lambda i: (0, 0), **res_kw),   # W1 resident
                pl.BlockSpec((1, H_p), lambda i: (0, 0), **res_kw),      # b1 resident
                pl.BlockSpec((H_p, D_out_p), lambda i: (0, 0), **res_kw),  # W2 resident
                pl.BlockSpec((1, D_out_p), lambda i: (0, 0), **res_kw),  # b2 resident
            ],
            out_specs=pl.BlockSpec((tm, D_out_p), lambda i: (i, 0)),
        )
        return pl.pallas_call(
            mlp_decoder_kernel,
            out_shape=jax.ShapeDtypeStruct((rows, D_out_p), out_dt),
            grid_spec=grid_spec,
            compiler_params=pltpu.CompilerParams(
                dimension_semantics=("parallel",),
                vmem_limit_bytes=vmem_limit,
            ),
            cost_estimate=cost,
        )(x2d, w1p, b1p, w2p, b2p)

    try:
        out2d = _run(True)
    except Exception:
        # pipeline_mode=pl.Buffered(1) not supported by this jax/Mosaic build ->
        # fall back to default (double) buffering; VMEM estimate already covers it.
        out2d = _run(False)

    if D_out_p != D_out:
        out2d = out2d[:, :D_out]
    return out2d.reshape(B, S, D_out)


def init_mlp_decoder_params(key, in_dim, hidden_dim, out_dim, dtype=jnp.float32):
    """Deterministic init mirroring torch.nn.Linear default (uniform +-1/sqrt(fan_in))."""
    k1, k2, k3, k4 = jax.random.split(key, 4)
    lim1 = 1.0 / jnp.sqrt(in_dim)
    lim2 = 1.0 / jnp.sqrt(hidden_dim)
    w1 = jax.random.uniform(k1, (in_dim, hidden_dim), dtype, -lim1, lim1)
    b1 = jax.random.uniform(k2, (hidden_dim,), dtype, -lim1, lim1)
    w2 = jax.random.uniform(k3, (hidden_dim, out_dim), dtype, -lim2, lim2)
    b2 = jax.random.uniform(k4, (out_dim,), dtype, -lim2, lim2)
    return w1, b1, w2, b2


def _ref_mlp(x, w1, b1, w2, b2):
    B, S, D_in = x.shape
    h = jnp.maximum(x.reshape(B * S, D_in) @ w1 + b1, 0.0)
    return (h @ w2 + b2).reshape(B, S, w2.shape[1])


if __name__ == "__main__":
    key = jax.random.PRNGKey(0)
    kx, kp, kx2, kp2 = jax.random.split(key, 4)

    # Small shapes implied by forward(): token-level slot labelling logits.
    B, S, D_in, H, D_out = 2, 8, 32, 64, 16
    x = jax.random.normal(kx, (B, S, D_in), dtype=jnp.float32)
    w1, b1, w2, b2 = init_mlp_decoder_params(kp, D_in, H, D_out)
    ref = _ref_mlp(x, w1, b1, w2, b2)

    # 1) f32 compute path, forced through the Pallas kernel (tight tolerance).
    out_f32 = jax.block_until_ready(intent_slot_forward(
        x, w1, b1, w2, b2, compute_dtype=jnp.float32, min_rows_for_kernel=0))
    assert out_f32.shape == (B, S, D_out)
    assert jnp.allclose(out_f32, ref, atol=1e-5, rtol=1e-5)

    # 2) default bf16 MXU operands (in-kernel cast of x), f32 accumulation -> loose tol.
    out_bf16 = jax.block_until_ready(intent_slot_forward(
        x, w1, b1, w2, b2, min_rows_for_kernel=0))
    assert jnp.allclose(out_bf16, ref, atol=5e-2, rtol=5e-2)

    # 3) ragged multi-tile grid: 300 rows with a 128-row tile (no row padding anywhere).
    B2, S2 = 3, 100
    x2 = jax.random.normal(kx2, (B2, S2, D_in), dtype=jnp.float32)
    out_rag = jax.block_until_ready(intent_slot_forward(
        x2, w1, b1, w2, b2, row_tile=128, compute_dtype=jnp.float32,
        min_rows_for_kernel=0))
    assert out_rag.shape == (B2, S2, D_out)
    assert jnp.allclose(out_rag, _ref_mlp(x2, w1, b1, w2, b2), atol=1e-5, rtol=1e-5)

    # 4) padded-output branch (D_out = 96 >= 64, padded to 128 then sliced).
    w1b, b1b, w2b, b2b = init_mlp_decoder_params(kp2, D_in, H, 96)
    out_pad = jax.block_until_ready(intent_slot_forward(
        x, w1b, b1b, w2b, b2b, compute_dtype=jnp.float32, min_rows_for_kernel=0))
    assert out_pad.shape == (B, S, 96)
    assert jnp.allclose(out_pad, _ref_mlp(x, w1b, b1b, w2b, b2b), atol=1e-5, rtol=1e-5)

    # 5) small-problem fallback (default threshold): plain XLA path, exact match.
    out_fb = jax.block_until_ready(intent_slot_forward(x, w1, b1, w2, b2))
    assert jnp.allclose(out_fb, ref, atol=1e-5, rtol=1e-5)

    # TODO(synk): `encode` (per-word DocNN/RoBERTa encoder Python loop) and the
    # ClassificationHead results/loss are not part of forward(); not implemented here.
    print("KERNEL_OK")
</pallas_src>

<mosaic_0001>
module attributes {stable_mosaic.version = 11 : i64} {
  func.func @mlp_decoder_kernel(%arg0: i32, %arg1: memref<16x32xf32, #tpu.memory_space<vmem>>, %arg2: memref<32x128xf32, #tpu.memory_space<vmem>>, %arg3: memref<1x128xf32, #tpu.memory_space<vmem>>, %arg4: memref<128x16xf32, #tpu.memory_space<vmem>>, %arg5: memref<1x16xf32, #tpu.memory_space<vmem>>, %arg6: memref<16x16xf32, #tpu.memory_space<vmem>>) attributes {dimension_semantics = [#tpu.dimension_semantics<parallel>], iteration_bounds = array<i64: 1>, scalar_prefetch = 0 : i64, scratch_operands = 0 : i64, tpu.core_type = #tpu.core_type<tc>, window_params = [{transform_indices = @transform_0, window_bounds = array<i64: 16, 32>}, {pipeline_mode = #tpu.pipeline_mode<synchronous>, transform_indices = @transform_1, window_bounds = array<i64: 32, 128>}, {pipeline_mode = #tpu.pipeline_mode<synchronous>, transform_indices = @transform_2, window_bounds = array<i64: 1, 128>}, {pipeline_mode = #tpu.pipeline_mode<synchronous>, transform_indices = @transform_3, window_bounds = array<i64: 128, 16>}, {pipeline_mode = #tpu.pipeline_mode<synchronous>, transform_indices = @transform_4, window_bounds = array<i64: 1, 16>}, {transform_indices = @transform_5, window_bounds = array<i64: 16, 16>}]} {
    %c0 = arith.constant 0 : index
    %c0_0 = arith.constant 0 : index
    %0 = vector.load %arg1[%c0, %c0_0] : memref<16x32xf32, #tpu.memory_space<vmem>>, vector<16x32xf32>
    %c0_1 = arith.constant 0 : index
    %c0_2 = arith.constant 0 : index
    %1 = vector.load %arg2[%c0_1, %c0_2] : memref<32x128xf32, #tpu.memory_space<vmem>>, vector<32x128xf32>
    %cst = arith.constant dense<0.000000e+00> : vector<16x128xf32>
    %2 = tpu.matmul %0, %1, %cst {dimension_numbers = #tpu.dot_dimension_numbers<[1], [0], [0], [1], [0, 0, 1, 1], [], []>} : vector<16x32xf32>, vector<32x128xf32>, vector<16x128xf32> -> vector<16x128xf32>
    %c0_3 = arith.constant 0 : index
    %c0_4 = arith.constant 0 : index
    %3 = vector.load %arg3[%c0_3, %c0_4] : memref<1x128xf32, #tpu.memory_space<vmem>>, vector<1x128xf32>
    %4 = vector.broadcast %3 : vector<1x128xf32> to vector<16x128xf32>
    %5 = arith.addf %2, %4 : vector<16x128xf32>
    %cst_5 = arith.constant 0.000000e+00 : f32
    %6 = vector.broadcast %cst_5 : f32 to vector<16x128xf32>
    %7 = arith.maximumf %5, %6 : vector<16x128xf32>
    %c0_6 = arith.constant 0 : index
    %c0_7 = arith.constant 0 : index
    %8 = vector.load %arg4[%c0_6, %c0_7] : memref<128x16xf32, #tpu.memory_space<vmem>>, vector<128x16xf32>
    %cst_8 = arith.constant dense<0.000000e+00> : vector<16x16xf32>
    %9 = tpu.matmul %7, %8, %cst_8 {dimension_numbers = #tpu.dot_dimension_numbers<[1], [0], [0], [1], [0, 0, 1, 1], [], []>} : vector<16x128xf32>, vector<128x16xf32>, vector<16x16xf32> -> vector<16x16xf32>
    %c0_9 = arith.constant 0 : index
    %c0_10 = arith.constant 0 : index
    %10 = vector.load %arg5[%c0_9, %c0_10] : memref<1x16xf32, #tpu.memory_space<vmem>>, vector<1x16xf32>
    %11 = vector.broadcast %10 : vector<1x16xf32> to vector<16x16xf32>
    %12 = arith.addf %9, %11 : vector<16x16xf32>
    %c0_11 = arith.constant 0 : index
    %c0_12 = arith.constant 0 : index
    %13 = vector.load %arg6[%c0_11, %c0_12] : memref<16x16xf32, #tpu.memory_space<vmem>>, vector<16x16xf32>
    tpu.vector_store %arg6[%c0_11, %c0_12], %12 {strides = array<i32>} : memref<16x16xf32, #tpu.memory_space<vmem>>, vector<16x16xf32>,
    return
  }
  func.func @transform_0(%arg0: i32) -> (i32, i32) {
    %c0_i32 = arith.constant 0 : i32
    %c0_i32_0 = arith.constant 0 : i32
    return %arg0, %c0_i32 : i32, i32
  }
  func.func @transform_1(%arg0: i32) -> (i32, i32) {
    %c0_i32 = arith.constant 0 : i32
    %c0_i32_0 = arith.constant 0 : i32
    %c0_i32_1 = arith.constant 0 : i32
    return %c0_i32, %c0_i32_0 : i32, i32
  }
  func.func @transform_2(%arg0: i32) -> (i32, i32) {
    %c0_i32 = arith.constant 0 : i32
    %c0_i32_0 = arith.constant 0 : i32
    %c0_i32_1 = arith.constant 0 : i32
    return %c0_i32, %c0_i32_0 : i32, i32
  }
  func.func @transform_3(%arg0: i32) -> (i32, i32) {
    %c0_i32 = arith.constant 0 : i32
    %c0_i32_0 = arith.constant 0 : i32
    %c0_i32_1 = arith.constant 0 : i32
    return %c0_i32, %c0_i32_0 : i32, i32
  }
  func.func @transform_4(%arg0: i32) -> (i32, i32) {
    %c0_i32 = arith.constant 0 : i32
    %c0_i32_0 = arith.constant 0 : i32
    %c0_i32_1 = arith.constant 0 : i32
    return %c0_i32, %c0_i32_0 : i32, i32
  }
  func.func @transform_5(%arg0: i32) -> (i32, i32) {
    %c0_i32 = arith.constant 0 : i32
    %c0_i32_0 = arith.constant 0 : i32
    return %arg0, %c0_i32 : i32, i32
  }
}

module attributes {stable_mosaic.version = 11 : i64} {
  func.func @mlp_decoder_kernel(%arg0: i32, %arg1: memref<16x32xf32, #tpu.memory_space<vmem>>, %arg2: memref<32x128xf32, #tpu.memory_space<vmem>>, %arg3: memref<1x128xf32, #tpu.memory_space<vmem>>, %arg4: memref<128x16xf32, #tpu.memory_space<vmem>>, %arg5: memref<1x16xf32, #tpu.memory_space<vmem>>, %arg6: memref<16x16xf32, #tpu.memory_space<vmem>>) attributes {dimension_semantics = [#tpu.dimension_semantics<parallel>], iteration_bounds = array<i64: 1>, scalar_prefetch = 0 : i64, scratch_operands = 0 : i64, tpu.core_type = #tpu.core_type<tc>, window_params = [{transform_indices = @transform_0, window_bounds = array<i64: 16, 32>}, {pipeline_mode = #tpu.pipeline_mode<synchronous>, transform_indices = @transform_1, window_bounds = array<i64: 32, 128>}, {pipeline_mode = #tpu.pipeline_mode<synchronous>, transform_indices = @transform_2, window_bounds = array<i64: 1, 128>}, {pipeline_mode = #tpu.pipeline_mode<synchronous>, transform_indices = @transform_3, window_bounds = array<i64: 128, 16>}, {pipeline_mode = #tpu.pipeline_mode<synchronous>, transform_indices = @transform_4, window_bounds = array<i64: 1, 16>}, {transform_indices = @transform_5, window_bounds = array<i64: 16, 16>}]} {
    %c0 = arith.constant 0 : index
    %c0_0 = arith.constant 0 : index
    %0 = vector.load %arg1[%c0, %c0_0] : memref<16x32xf32, #tpu.memory_space<vmem>>, vector<16x32xf32>
    %c0_1 = arith.constant 0 : index
    %c0_2 = arith.constant 0 : index
    %1 = vector.load %arg2[%c0_1, %c0_2] : memref<32x128xf32, #tpu.memory_space<vmem>>, vector<32x128xf32>
    %cst = arith.constant dense<0.000000e+00> : vector<16x128xf32>
    %2 = tpu.matmul %0, %1, %cst {dimension_numbers = #tpu.dot_dimension_numbers<[1], [0], [0], [1], [0, 0, 1, 1], [], []>} : vector<16x32xf32>, vector<32x128xf32>, vector<16x128xf32> -> vector<16x128xf32>
    %c0_3 = arith.constant 0 : index
    %c0_4 = arith.constant 0 : index
    %3 = vector.load %arg3[%c0_3, %c0_4] : memref<1x128xf32, #tpu.memory_space<vmem>>, vector<1x128xf32>
    %4 = vector.broadcast %3 : vector<1x128xf32> to vector<16x128xf32>
    %5 = arith.addf %2, %4 : vector<16x128xf32>
    %cst_5 = arith.constant 0.000000e+00 : f32
    %6 = vector.broadcast %cst_5 : f32 to vector<16x128xf32>
    %7 = arith.maximumf %5, %6 : vector<16x128xf32>
    %c0_6 = arith.constant 0 : index
    %c0_7 = arith.constant 0 : index
    %8 = vector.load %arg4[%c0_6, %c0_7] : memref<128x16xf32, #tpu.memory_space<vmem>>, vector<128x16xf32>
    %cst_8 = arith.constant dense<0.000000e+00> : vector<16x16xf32>
    %9 = tpu.matmul %7, %8, %cst_8 {dimension_numbers = #tpu.dot_dimension_numbers<[1], [0], [0], [1], [0, 0, 1, 1], [], []>} : vector<16x128xf32>, vector<128x16xf32>, vector<16x16xf32> -> vector<16x16xf32>
    %c0_9 = arith.constant 0 : index
    %c0_10 = arith.constant 0 : index
    %10 = vector.load %arg5[%c0_9, %c0_10] : memref<1x16xf32, #tpu.memory_space<vmem>>, vector<1x16xf32>
    %11 = vector.broadcast %10 : vector<1x16xf32> to vector<16x16xf32>
    %12 = arith.addf %9, %11 : vector<16x16xf32>
    %c0_11 = arith.constant 0 : index
    %c0_12 = arith.constant 0 : index
    %13 = vector.load %arg6[%c0_11, %c0_12] : memref<16x16xf32, #tpu.memory_space<vmem>>, vector<16x16xf32>
    tpu.vector_store %arg6[%c0_11, %c0_12], %12 {strides = array<i32>} : memref<16x16xf32, #tpu.memory_space<vmem>>, vector<16x16xf32>,
    return
  }
  func.func @transform_0(%arg0: i32) -> (i32, i32) {
    %c0_i32 = arith.constant 0 : i32
    %c0_i32_0 = arith.constant 0 : i32
    return %arg0, %c0_i32 : i32, i32
  }
  func.func @transform_1(%arg0: i32) -> (i32, i32) {
    %c0_i32 = arith.constant 0 : i32
    %c0_i32_0 = arith.constant 0 : i32
    %c0_i32_1 = arith.constant 0 : i32
    return %c0_i32, %c0_i32_0 : i32, i32
  }
  func.func @transform_2(%arg0: i32) -> (i32, i32) {
    %c0_i32 = arith.constant 0 : i32
    %c0_i32_0 = arith.constant 0 : i32
    %c0_i32_1 = arith.constant 0 : i32
    return %c0_i32, %c0_i32_0 : i32, i32
  }
  func.func @transform_3(%arg0: i32) -> (i32, i32) {
    %c0_i32 = arith.constant 0 : i32
    %c0_i32_0 = arith.constant 0 : i32
    %c0_i32_1 = arith.constant 0 : i32
    return %c0_i32, %c0_i32_0 : i32, i32
  }
  func.func @transform_4(%arg0: i32) -> (i32, i32) {
    %c0_i32 = arith.constant 0 : i32
    %c0_i32_0 = arith.constant 0 : i32
    %c0_i32_1 = arith.constant 0 : i32
    return %c0_i32, %c0_i32_0 : i32, i32
  }
  func.func @transform_5(%arg0: i32) -> (i32, i32) {
    %c0_i32 = arith.constant 0 : i32
    %c0_i32_0 = arith.constant 0 : i32
    return %arg0, %c0_i32 : i32, i32
  }
}

</mosaic_0001>

<bundles_post_ra>
// kernel: tpu_custom_call.1
= control target key start
LH: loop header
LB: loop body
LE: loop exit
PB: predicated region body
PF: predicated region fallthrough
CT: control target
= control target key end

     0   :  { %vm34_vm0 = vcmask 261120   ;;  %s495_s0 = inlined_call_operand.vmem [shape: f32[16,32], index: 0, kind: input, shape index: {}]   ;;  %s496_s1 = inlined_call_operand.vmem [shape: f32[32,128], index: 1, kind: input, shape index: {}]   ;;  %s497_s2 = inlined_call_operand.vmem [shape: f32[1,128], index: 2, kind: input, shape index: {}]   ;;  %s498_s3 = inlined_call_operand.vmem [shape: f32[128,16], index: 3, kind: input, shape index: {}]   ;;  %s499_s4 = inlined_call_operand.vmem [shape: f32[1,16], index: 4, kind: input, shape index: {}]   ;;  %s500_s5 = inlined_call_operand.hbm [shape: f32[16,16], index: 5, kind: output, shape index: {}]  }
   0x1   :  { %v23_v0 = vld [vmem:[%s496_s1] sm:$0xff]  ;;  %v24_v1 = vld [vmem:[%s496_s1 + $0x8] sm:$0xff]  ;;  %v25_v2 = vld [vmem:[%s496_s1 + $0x10] sm:$0xff] }
   0x2   :  { %v309_v3 = vpack.c.bf16 %v24_v1, %v23_v0  ;;  %v26_v4 = vld [vmem:[%s496_s1 + $0x18] sm:$0xff]  ;;  %v21_v5 = vld [vmem:[%s495_s0] sm:$0xff]  ;;  %v119_v8 = vld [vmem:[%s498_s3 + $0x8] sm:$0xff] }
   0x3   :  { %v313_v6 = vpack.c.bf16 %v26_v4, %v25_v2  ;;  %271 = vmatprep.mubr.msk.f32.mxu0 %vm34_vm0, %v21_v5  ;;  %v118_v7 = vld [vmem:[%s498_s3] sm:$0xff]  ;;  %v120_v9 = vld [vmem:[%s498_s3 + $0x10] sm:$0xff]  ;;  %v121_v11 = vld [vmem:[%s498_s3 + $0x18] sm:$0xff] }
   0x4   :  { %310 = vmatprep.subr.bf16.mxu0 %v309_v3  ;;  %v317_v10 = vpack.c.bf16 %v119_v8, %v118_v7  ;;  %v321_v12 = vpack.c.bf16 %v121_v11, %v120_v9  ;;  %v122_v13 = vld [vmem:[%s498_s3 + $0x20] sm:$0xff]  ;;  %v123_v14 = vld [vmem:[%s498_s3 + $0x28] sm:$0xff] }
   0x5   :  { %312 = vmatpush3.bf16.msra.mxu0 %v309_v3 }
   0x6   :  { %314 = vmatprep.subr.bf16.mxu0 %v313_v6  ;;  %318 = vmatprep.subr.bf16.mxu1 %v317_v10 }
   0x7   :  { %320 = vmatpush3.bf16.msra.mxu1 %v317_v10 }
   0x8   :  { %10 = vsyncpa [#allocation3], 0  ;;  %322 = vmatprep.subr.bf16.mxu1 %v321_v12  ;;  %v325_v15 = vpack.c.bf16 %v123_v14, %v122_v13  ;;  %v22_v16 = vld [vmem:[%s495_s0 + $0x8] sm:$0xff]  ;;  %v124_v17 = vld [vmem:[%s498_s3 + $0x30] sm:$0xff]  ;;  %vm216_vm1 = vcmask 130048  }
   0x9   :  { %316 = vmatpush3.bf16.msra.mxu0 %v313_v6  ;;  %v125_v18 = vld [vmem:[%s498_s3 + $0x38] sm:$0xff]  ;;  %v126_v20 = vld [vmem:[%s498_s3 + $0x40] sm:$0xff]  ;;  %v127_v21 = vld [vmem:[%s498_s3 + $0x48] sm:$0xff] }
   0xa   :  { %v329_v19 = vpack.c.bf16 %v125_v18, %v124_v17  ;;  %v333_v22 = vpack.c.bf16 %v127_v21, %v126_v20  ;;  %v128_v23 = vld [vmem:[%s498_s3 + $0x50] sm:$0xff]  ;;  %v129_v24 = vld [vmem:[%s498_s3 + $0x58] sm:$0xff]  ;;  %v130_v26 = vld [vmem:[%s498_s3 + $0x60] sm:$0xff] }
   0xb   :  { %324 = vmatpush3.bf16.msra.mxu1 %v321_v12  ;;  %v337_v25 = vpack.c.bf16 %v129_v24, %v128_v23  ;;  %v131_v27 = vld [vmem:[%s498_s3 + $0x68] sm:$0xff]  ;;  %v132_v29 = vld [vmem:[%s498_s3 + $0x70] sm:$0xff]  ;;  %v133_v30 = vld [vmem:[%s498_s3 + $0x78] sm:$0xff]  ;;  %s376_s3 = smov [#allocation2]  }
   0xc   :  { %272 = vmatmul.mubr.msk.f32.vlgmr.msra.gmra.mrb[0].mxu0 %vm34_vm0, %v22_v16  ;;  %326 = vmatprep.subr.bf16.mxu1 %v325_v15  ;;  %v341_v28 = vpack.c.bf16 %v131_v27, %v130_v26  ;;  %v345_v31 = vpack.c.bf16 %v133_v30, %v132_v29  ;;  %v235_v32 = vld [vmem:[%s497_s2] ss:$0 sm:$0xff]  ;;  %s224_s13 = sshll.u32 %s376_s3, 4  ;;  %s225_s13 = int_to_ptr.vmem [resolvable:$true] %s224_s13 }
   0xd   :  { %v238_v39 = vld [vmem:[%s499_s4] ss:$0 sm:$0xff]  ;;  %s352_s2 = scalar_lea.vmem %s225_s13, 256  ;;  %p357_p1 = scmp.lt.s32.totalorder %s225_s13, %s225_s13 }
   0xe   :  { %p353_p0 = scmp.ne.s32.totalorder %s225_s13, %s352_s2  ;;  %p358_p2 = scmp.lt.s32.totalorder %s352_s2, %s352_s2 }
   0xf   :  { %328 = vmatpush3.bf16.msra.mxu1 %v325_v15 }
  0x10   :  { %330 = vmatprep.subr.bf16.mxu1 %v329_v19  ;;  %p359_p3 = por %p358_p2, %p357_p1 }
  0x12   :  { %p360_p4 = pnand %p359_p3, %p353_p0 }
  0x13   :  { %332 = vmatpush3.bf16.msra.mxu1 %v329_v19 }
  0x14   :  { %334 = vmatprep.subr.bf16.mxu1 %v333_v22 }
  0x17   :  { %336 = vmatpush3.bf16.msra.mxu1 %v333_v22 }
  0x18   :  { %338 = vmatprep.subr.bf16.mxu1 %v337_v25 }
  0x1b   :  { %340 = vmatpush3.bf16.msra.mxu1 %v337_v25 }
  0x1c   :  { %342 = vmatprep.subr.bf16.mxu1 %v341_v28 }
  0x1f   :  { %344 = vmatpush3.bf16.msra.mxu1 %v341_v28 }
  0x20   :  { %346 = vmatprep.subr.bf16.mxu1 %v345_v31 }
  0x23   :  { %348 = vmatpush3.bf16.msra.mxu1 %v345_v31 }
  0xdf   :  { %v273_v33 = vpop.f32.mrb[0].mxu0 }
  0xe0   :  { %v113_v34 = vadd.f32 %v273_v33, %v235_v32  ;;  %v107_v35 = vpop.f32.mrb[1].mxu0 }
  0xe1   :  { %v108_v36 = vadd.f32 %v235_v32, %v107_v35 }
  0xe2   :  { %v117_v38 = vmax.f32 %v113_v34, 0.0 }
  0xe3   :  { %v116_v37 = vmax.f32 %v108_v36, 0.0 }
  0xe5   :  { %306 = vmatprep.mubr.f32.mxu1 %v116_v37 }
  0xe6   :  { %307 = vmatmul.mubr.f32.vlgmr.msra.gmra.mrb[0].mxu1 %v117_v38 }
 0x1b9   :  { %v308_v40 = vpop.f32.mrb[0].mxu1 }
 0x1ba   :  { %v213_v41 = vadd.f32 %v308_v40, %v238_v39  ;;  %v207_v42 = vpop.f32.mrb[1].mxu1 }
 0x1bb   :  { %v208_v43 = vadd.f32 %v238_v39, %v207_v42 }
 0x1bc   :  { %218 = vst.msk [vmem:[#allocation2 + $0x8] sm:$0xff] %vm216_vm1, %v213_v41 }
 0x1bd   :  { %217 = vst.msk [vmem:[#allocation2] sm:$0xff] %vm216_vm1, %v208_v43 }
 0x1be   :  { %363 = shalt.err (!%p360_p4)
}
 0x1bf   :  { %s364_s4 = scalar_lea.hbm %s500_s5, 256 }
 0x1c0   :  { %p365_p5 = scmp.ne.s32.totalorder %s500_s5, %s364_s4  ;;  %p368_p6 = scmp.lt.u32.totalorder %s364_s4, %s500_s5 }
 0x1c2   :  { %p370_p7 = pnand %p368_p6, %p365_p5 }
 0x1c4   :  { %373 = shalt.err (!%p370_p7)
}
 0x1c5   :  { %s377_s20 = smov 128   ;;  %s378_s21 = smov 8  }
 0x1c6   :  { %230 = dma.vmem_to_hbm [thread:$0]  %s225_s13, 256, %s500_s5, [#allocation3], %s377_s20, %s377_s20, %s378_s21  }
 0x1c7   :  { %374 = dma.done.wait [#allocation3], 256  }
 0x1c8   :  { %375 = vsyncadd [#allocation3], 4294967040 }
 0x1c9   :  { %234 = vsyncpa [#allocation3], 1 }

// kernel: tpu_custom_call.1
= control target key start
LH: loop header
LB: loop body
LE: loop exit
PB: predicated region body
PF: predicated region fallthrough
CT: control target
= control target key end

     0   :  { %vm34_vm0 = vcmask 261120   ;;  %s495_s0 = inlined_call_operand.vmem [shape: f32[16,32], index: 0, kind: input, shape index: {}]   ;;  %s496_s1 = inlined_call_operand.vmem [shape: f32[32,128], index: 1, kind: input, shape index: {}]   ;;  %s497_s2 = inlined_call_operand.vmem [shape: f32[1,128], index: 2, kind: input, shape index: {}]   ;;  %s498_s3 = inlined_call_operand.vmem [shape: f32[128,16], index: 3, kind: input, shape index: {}]   ;;  %s499_s4 = inlined_call_operand.vmem [shape: f32[1,16], index: 4, kind: input, shape index: {}]   ;;  %s500_s5 = inlined_call_operand.hbm [shape: f32[16,16], index: 5, kind: output, shape index: {}]  }
   0x1   :  { %v23_v0 = vld [vmem:[%s496_s1] sm:$0xff]  ;;  %v24_v1 = vld [vmem:[%s496_s1 + $0x8] sm:$0xff]  ;;  %v25_v2 = vld [vmem:[%s496_s1 + $0x10] sm:$0xff] }
   0x2   :  { %v309_v3 = vpack.c.bf16 %v24_v1, %v23_v0  ;;  %v26_v4 = vld [vmem:[%s496_s1 + $0x18] sm:$0xff]  ;;  %v21_v5 = vld [vmem:[%s495_s0] sm:$0xff]  ;;  %v119_v8 = vld [vmem:[%s498_s3 + $0x8] sm:$0xff] }
   0x3   :  { %v313_v6 = vpack.c.bf16 %v26_v4, %v25_v2  ;;  %271 = vmatprep.mubr.msk.f32.mxu0 %vm34_vm0, %v21_v5  ;;  %v118_v7 = vld [vmem:[%s498_s3] sm:$0xff]  ;;  %v120_v9 = vld [vmem:[%s498_s3 + $0x10] sm:$0xff]  ;;  %v121_v11 = vld [vmem:[%s498_s3 + $0x18] sm:$0xff] }
   0x4   :  { %310 = vmatprep.subr.bf16.mxu0 %v309_v3  ;;  %v317_v10 = vpack.c.bf16 %v119_v8, %v118_v7  ;;  %v321_v12 = vpack.c.bf16 %v121_v11, %v120_v9  ;;  %v122_v13 = vld [vmem:[%s498_s3 + $0x20] sm:$0xff]  ;;  %v123_v14 = vld [vmem:[%s498_s3 + $0x28] sm:$0xff] }
   0x5   :  { %312 = vmatpush3.bf16.msra.mxu0 %v309_v3 }
   0x6   :  { %314 = vmatprep.subr.bf16.mxu0 %v313_v6  ;;  %318 = vmatprep.subr.bf16.mxu1 %v317_v10 }
   0x7   :  { %320 = vmatpush3.bf16.msra.mxu1 %v317_v10 }
   0x8   :  { %10 = vsyncpa [#allocation3], 0  ;;  %322 = vmatprep.subr.bf16.mxu1 %v321_v12  ;;  %v325_v15 = vpack.c.bf16 %v123_v14, %v122_v13  ;;  %v22_v16 = vld [vmem:[%s495_s0 + $0x8] sm:$0xff]  ;;  %v124_v17 = vld [vmem:[%s498_s3 + $0x30] sm:$0xff]  ;;  %vm216_vm1 = vcmask 130048  }
   0x9   :  { %316 = vmatpush3.bf16.msra.mxu0 %v313_v6  ;;  %v125_v18 = vld [vmem:[%s498_s3 + $0x38] sm:$0xff]  ;;  %v126_v20 = vld [vmem:[%s498_s3 + $0x40] sm:$0xff]  ;;  %v127_v21 = vld [vmem:[%s498_s3 + $0x48] sm:$0xff] }
   0xa   :  { %v329_v19 = vpack.c.bf16 %v125_v18, %v124_v17  ;;  %v333_v22 = vpack.c.bf16 %v127_v21, %v126_v20  ;;  %v128_v23 = vld [vmem:[%s498_s3 + $0x50] sm:$0xff]  ;;  %v129_v24 = vld [vmem:[%s498_s3 + $0x58] sm:$0xff]  ;;  %v130_v26 = vld [vmem:[%s498_s3 + $0x60] sm:$0xff] }
   0xb   :  { %324 = vmatpush3.bf16.msra.mxu1 %v321_v12  ;;  %v337_v25 = vpack.c.bf16 %v129_v24, %v128_v23  ;;  %v131_v27 = vld [vmem:[%s498_s3 + $0x68] sm:$0xff]  ;;  %v132_v29 = vld [vmem:[%s498_s3 + $0x70] sm:$0xff]  ;;  %v133_v30 = vld [vmem:[%s498_s3 + $0x78] sm:$0xff]  ;;  %s376_s3 = smov [#allocation2]  }
   0xc   :  { %272 = vmatmul.mubr.msk.f32.vlgmr.msra.gmra.mrb[0].mxu0 %vm34_vm0, %v22_v16  ;;  %326 = vmatprep.subr.bf16.mxu1 %v325_v15  ;;  %v341_v28 = vpack.c.bf16 %v131_v27, %v130_v26  ;;  %v345_v31 = vpack.c.bf16 %v133_v30, %v132_v29  ;;  %v235_v32 = vld [vmem:[%s497_s2] ss:$0 sm:$0xff]  ;;  %s224_s13 = sshll.u32 %s376_s3, 4  ;;  %s225_s13 = int_to_ptr.vmem [resolvable:$true] %s224_s13 }
   0xd   :  { %v238_v39 = vld [vmem:[%s499_s4] ss:$0 sm:$0xff]  ;;  %s352_s2 = scalar_lea.vmem %s225_s13, 256  ;;  %p357_p1 = scmp.lt.s32.totalorder %s225_s13, %s225_s13 }
   0xe   :  { %p353_p0 = scmp.ne.s32.totalorder %s225_s13, %s352_s2  ;;  %p358_p2 = scmp.lt.s32.totalorder %s352_s2, %s352_s2 }
   0xf   :  { %328 = vmatpush3.bf16.msra.mxu1 %v325_v15 }
  0x10   :  { %330 = vmatprep.subr.bf16.mxu1 %v329_v19  ;;  %p359_p3 = por %p358_p2, %p357_p1 }
  0x12   :  { %p360_p4 = pnand %p359_p3, %p353_p0 }
  0x13   :  { %332 = vmatpush3.bf16.msra.mxu1 %v329_v19 }
  0x14   :  { %334 = vmatprep.subr.bf16.mxu1 %v333_v22 }
  0x17   :  { %336 = vmatpush3.bf16.msra.mxu1 %v333_v22 }
  0x18   :  { %338 = vmatprep.subr.bf16.mxu1 %v337_v25 }
  0x1b   :  { %340 = vmatpush3.bf16.msra.mxu1 %v337_v25 }
  0x1c   :  { %342 = vmatprep.subr.bf16.mxu1 %v341_v28 }
  0x1f   :  { %344 = vmatpush3.bf16.msra.mxu1 %v341_v28 }
  0x20   :  { %346 = vmatprep.subr.bf16.mxu1 %v345_v31 }
  0x23   :  { %348 = vmatpush3.bf16.msra.mxu1 %v345_v31 }
  0xdf   :  { %v273_v33 = vpop.f32.mrb[0].mxu0 }
  0xe0   :  { %v113_v34 = vadd.f32 %v273_v33, %v235_v32  ;;  %v107_v35 = vpop.f32.mrb[1].mxu0 }
  0xe1   :  { %v108_v36 = vadd.f32 %v235_v32, %v107_v35 }
  0xe2   :  { %v117_v38 = vmax.f32 %v113_v34, 0.0 }
  0xe3   :  { %v116_v37 = vmax.f32 %v108_v36, 0.0 }
  0xe5   :  { %306 = vmatprep.mubr.f32.mxu1 %v116_v37 }
  0xe6   :  { %307 = vmatmul.mubr.f32.vlgmr.msra.gmra.mrb[0].mxu1 %v117_v38 }
 0x1b9   :  { %v308_v40 = vpop.f32.mrb[0].mxu1 }
 0x1ba   :  { %v213_v41 = vadd.f32 %v308_v40, %v238_v39  ;;  %v207_v42 = vpop.f32.mrb[1].mxu1 }
 0x1bb   :  { %v208_v43 = vadd.f32 %v238_v39, %v207_v42 }
 0x1bc   :  { %218 = vst.msk [vmem:[#allocation2 + $0x8] sm:$0xff] %vm216_vm1, %v213_v41 }
 0x1bd   :  { %217 = vst.msk [vmem:[#allocation2] sm:$0xff] %vm216_vm1, %v208_v43 }
 0x1be   :  { %363 = shalt.err (!%p360_p4)
}
 0x1bf   :  { %s364_s4 = scalar_lea.hbm %s500_s5, 256 }
 0x1c0   :  { %p365_p5 = scmp.ne.s32.totalorder %s500_s5, %s364_s4  ;;  %p368_p6 = scmp.lt.u32.totalorder %s364_s4, %s500_s5 }
 0x1c2   :  { %p370_p7 = pnand %p368_p6, %p365_p5 }
 0x1c4   :  { %373 = shalt.err (!%p370_p7)
}
 0x1c5   :  { %s377_s20 = smov 128   ;;  %s378_s21 = smov 8  }
 0x1c6   :  { %230 = dma.vmem_to_hbm [thread:$0]  %s225_s13, 256, %s500_s5, [#allocation3], %s377_s20, %s377_s20, %s378_s21  }
 0x1c7   :  { %374 = dma.done.wait [#allocation3], 256  }
 0x1c8   :  { %375 = vsyncadd [#allocation3], 4294967040 }
 0x1c9   :  { %234 = vsyncpa [#allocation3], 1 }

</bundles_post_ra>
